<compile_context>
chip_gen: v7x
topology: tpu7x:2x2x1
jax: 0.10.0
libtpu: 0.0.40
codegen_flags: <defaults>
</compile_context>

<pallas_src>
import functools

import jax
import jax.numpy as jnp
from jax import lax
from jax.experimental import pallas as pl
from jax.experimental.pallas import tpu as pltpu

MASK_LOGIT_CONST = 1000000000.0


def _matching_kernel(xq_ref, xk_ref, m_ref, w1t_ref, w2t_ref, b_ref, g_ref,
                     bt_ref, o_ref, *, eps):
    # One (batch, query-tile) pair per grid step.
    xq = xq_ref[0]                              # (TQ, H) compute dtype (bf16)
    xk = xk_ref[0]                              # (S,  H) compute dtype (bf16), full keys
    mask = m_ref[0].astype(jnp.float32)         # (TQ, S)

    h = xq.shape[-1]
    scale = 1.0 / (h ** 0.5)
    # Fold 1/sqrt(H) into the (TQ,H) query operand (cheaper than scaling the (TQ,S) scores).
    xq_s = xq * jnp.asarray(scale, dtype=xq.dtype)

    # scores = (xq / sqrt(H)) @ xk^T, contracting the last dim of both (no explicit transpose).
    scores = lax.dot_general(
        xq_s, xk,
        dimension_numbers=(((1,), (1,)), ((), ())),
        preferred_element_type=jnp.float32)     # (TQ, S) f32

    # logits_mask: scores*mask - 1e9*(1-mask)  ==  scores*mask + (mask-1)*1e9
    scores = scores * mask + (mask - 1.0) * MASK_LOGIT_CONST

    # Numerically stable softmax; defer the 1/denominator to the (TQ,H) context.
    scores = scores - jnp.max(scores, axis=-1, keepdims=True)
    e = jnp.exp(scores)                                          # (TQ, S) f32, values in [0,1]
    inv = pl.reciprocal(jnp.sum(e, axis=-1, keepdims=True), approx=True)  # (TQ, 1) via EUP

    ctx = jnp.dot(e.astype(xk.dtype), xk,
                  preferred_element_type=jnp.float32) * inv      # (TQ, H) f32

    # concat([x, context], -1) @ W^T + b  ==  x @ W[:, :H]^T + context @ W[:, H:]^T + b
    matching = (jnp.dot(xq, w1t_ref[...], preferred_element_type=jnp.float32)
                + jnp.dot(ctx.astype(w2t_ref.dtype), w2t_ref[...],
                          preferred_element_type=jnp.float32)
                + b_ref[...])                                    # (TQ, H) f32

    # LayerNorm over last dim.
    mu = jnp.mean(matching, axis=-1, keepdims=True)
    var = jnp.mean(jnp.square(matching - mu), axis=-1, keepdims=True)
    y = (matching - mu) * lax.rsqrt(var + eps)
    y = y * g_ref[...] + bt_ref[...]

    o_ref[0] = y.astype(o_ref.dtype)


def matching_layer(x, masks, w, b, gamma, beta, *, eps=1e-12, q_tile=128,
                   compute_dtype=jnp.bfloat16, mask_dtype=jnp.bfloat16,
                   vmem_limit_bytes=None):
    """x: (B, S, H); masks: (B, S, S); w: (H, 2H); b, gamma, beta: (H,).

    Note: mask_dtype=bf16 is exact for 0/1 masks; pass jnp.float32 for fractional masks.
    """
    B, S, H = x.shape
    out_dtype = x.dtype

    # Pick a query tile and pad S so the grid divides evenly. Padded key columns get mask=0
    # (-> exactly zero probability after softmax) and padded query rows are sliced off.
    if S >= q_tile:
        tq = q_tile
        s_pad = ((S + q_tile - 1) // q_tile) * q_tile
    else:
        s_pad = ((S + 7) // 8) * 8
        tq = s_pad
    pad = s_pad - S

    x_c = x.astype(compute_dtype)
    m_c = masks.astype(mask_dtype)
    if pad:
        x_c = jnp.pad(x_c, ((0, 0), (0, pad), (0, 0)))
        m_c = jnp.pad(m_c, ((0, 0), (0, pad), (0, pad)))

    w1t = w[:, :H].T.astype(compute_dtype)      # (H, H) = W[:, :H]^T
    w2t = w[:, H:].T.astype(compute_dtype)      # (H, H) = W[:, H:]^T
    b2 = b.reshape(1, H).astype(jnp.float32)
    g2 = gamma.reshape(1, H).astype(jnp.float32)
    bt2 = beta.reshape(1, H).astype(jnp.float32)

    nq = s_pad // tq
    kernel = functools.partial(_matching_kernel, eps=eps)

    out = pl.pallas_call(
        kernel,
        out_shape=jax.ShapeDtypeStruct((B, s_pad, H), out_dtype),
        grid_spec=pltpu.PrefetchScalarGridSpec(
            num_scalar_prefetch=0,
            grid=(B, nq),
            in_specs=[
                pl.BlockSpec((1, tq, H), lambda bi, qi: (bi, qi, 0)),     # x, query tile
                pl.BlockSpec((1, s_pad, H), lambda bi, qi: (bi, 0, 0)),   # x, full keys (reused across q)
                pl.BlockSpec((1, tq, s_pad), lambda bi, qi: (bi, qi, 0)), # mask rows for this q tile
                pl.BlockSpec((H, H), lambda bi, qi: (0, 0)),              # W[:, :H]^T
                pl.BlockSpec((H, H), lambda bi, qi: (0, 0)),              # W[:, H:]^T
                pl.BlockSpec((1, H), lambda bi, qi: (0, 0)),              # bias
                pl.BlockSpec((1, H), lambda bi, qi: (0, 0)),              # ln gamma
                pl.BlockSpec((1, H), lambda bi, qi: (0, 0)),              # ln beta
            ],
            out_specs=pl.BlockSpec((1, tq, H), lambda bi, qi: (bi, qi, 0)),
        ),
        compiler_params=pltpu.CompilerParams(
            dimension_semantics=("parallel", "parallel"),
            vmem_limit_bytes=vmem_limit_bytes),
    )(x_c, x_c, m_c, w1t, w2t, b2, g2, bt2)

    if pad:
        out = out[:, :S, :]
    return out


def matching_layer_ref(x, masks, w, b, gamma, beta, *, eps=1e-12):
    """Pure-JAX f32 reference mirroring the PyTorch forward (eval mode)."""
    H = x.shape[-1]
    scores = jnp.einsum("bqh,bkh->bqk", x, x) / jnp.sqrt(jnp.float32(H))
    scores = scores * masks + (-MASK_LOGIT_CONST) * (1.0 - masks)
    probs = jax.nn.softmax(scores, axis=-1)
    context = jnp.einsum("bqk,bkh->bqh", probs, x)
    cat = jnp.concatenate([x, context], axis=-1)
    matching = jnp.einsum("bsh,oh->bso", cat, w) + b
    mu = jnp.mean(matching, axis=-1, keepdims=True)
    var = jnp.mean(jnp.square(matching - mu), axis=-1, keepdims=True)
    return (matching - mu) / jnp.sqrt(var + eps) * gamma + beta


if __name__ == "__main__":
    B, S, H = 2, 8, 32
    key = jax.random.PRNGKey(0)
    kx, kw, kb = jax.random.split(key, 3)

    x = jax.random.normal(kx, (B, S, H), dtype=jnp.float32)

    # Deterministic mask: batch 0 has 6 valid key positions, batch 1 has 8.
    lens = jnp.array([6, 8], dtype=jnp.int32)
    key_mask = (jnp.arange(S)[None, :] < lens[:, None]).astype(jnp.float32)  # (B, S)
    masks = jnp.broadcast_to(key_mask[:, None, :], (B, S, S)).astype(jnp.float32)

    # Deterministic Linear(2H, H) params and LayerNorm params.
    w = 0.02 * jax.random.normal(kw, (H, 2 * H), dtype=jnp.float32)  # (out=H, in=2H)
    b = 0.01 * jax.random.normal(kb, (H,), dtype=jnp.float32)
    gamma = jnp.ones((H,), dtype=jnp.float32)
    beta = jnp.zeros((H,), dtype=jnp.float32)

    out = matching_layer(x, masks, w, b, gamma, beta)
    out = jax.block_until_ready(out)

    ref = matching_layer_ref(x, masks, w, b, gamma, beta)
    assert out.shape == (B, S, H)
    # bf16 MXU operands + approx reciprocal => loosened tolerance vs the f32 reference.
    assert jnp.allclose(out, ref, atol=5e-2, rtol=5e-2), "mismatch vs reference"

    # TODO(synk): dropout path (use_matching_dropout=True) omitted -- identity in eval mode.
    # TODO(synk): full flash-style k-tiling (online softmax) and lane-padding H<128 left as
    #             follow-ups; q-tiling already removes the O(S^2) VMEM temporaries.
    print("KERNEL_OK")
</pallas_src>

<mosaic_0001>
module attributes {stable_mosaic.version = 11 : i64} {
  func.func @_matching_kernel(%arg0: i32, %arg1: i32, %arg2: memref<1x8x32xbf16, #tpu.memory_space<vmem>>, %arg3: memref<1x8x32xbf16, #tpu.memory_space<vmem>>, %arg4: memref<1x8x8xbf16, #tpu.memory_space<vmem>>, %arg5: memref<32x32xbf16, #tpu.memory_space<vmem>>, %arg6: memref<32x32xbf16, #tpu.memory_space<vmem>>, %arg7: memref<1x32xf32, #tpu.memory_space<vmem>>, %arg8: memref<1x32xf32, #tpu.memory_space<vmem>>, %arg9: memref<1x32xf32, #tpu.memory_space<vmem>>, %arg10: memref<1x8x32xf32, #tpu.memory_space<vmem>>) attributes {dimension_semantics = [#tpu.dimension_semantics<parallel>, #tpu.dimension_semantics<parallel>], iteration_bounds = array<i64: 2, 1>, scalar_prefetch = 0 : i64, scratch_operands = 0 : i64, tpu.core_type = #tpu.core_type<tc>, window_params = [{transform_indices = @transform_0, window_bounds = array<i64: 1, 8, 32>}, {transform_indices = @transform_1, window_bounds = array<i64: 1, 8, 32>}, {transform_indices = @transform_2, window_bounds = array<i64: 1, 8, 8>}, {pipeline_mode = #tpu.pipeline_mode<synchronous>, transform_indices = @transform_3, window_bounds = array<i64: 32, 32>}, {pipeline_mode = #tpu.pipeline_mode<synchronous>, transform_indices = @transform_4, window_bounds = array<i64: 32, 32>}, {pipeline_mode = #tpu.pipeline_mode<synchronous>, transform_indices = @transform_5, window_bounds = array<i64: 1, 32>}, {pipeline_mode = #tpu.pipeline_mode<synchronous>, transform_indices = @transform_6, window_bounds = array<i64: 1, 32>}, {pipeline_mode = #tpu.pipeline_mode<synchronous>, transform_indices = @transform_7, window_bounds = array<i64: 1, 32>}, {transform_indices = @transform_8, window_bounds = array<i64: 1, 8, 32>}]} {
    %c0 = arith.constant 0 : index
    %c0_0 = arith.constant 0 : index
    %c0_1 = arith.constant 0 : index
    %0 = vector.load %arg2[%c0, %c0_0, %c0_1] : memref<1x8x32xbf16, #tpu.memory_space<vmem>>, vector<1x8x32xbf16>
    %1 = vector.shape_cast %0 : vector<1x8x32xbf16> to vector<8x32xbf16>
    %c0_2 = arith.constant 0 : index
    %c0_3 = arith.constant 0 : index
    %c0_4 = arith.constant 0 : index
    %2 = vector.load %arg3[%c0_2, %c0_3, %c0_4] : memref<1x8x32xbf16, #tpu.memory_space<vmem>>, vector<1x8x32xbf16>
    %3 = vector.shape_cast %2 : vector<1x8x32xbf16> to vector<8x32xbf16>
    %c0_5 = arith.constant 0 : index
    %c0_6 = arith.constant 0 : index
    %c0_7 = arith.constant 0 : index
    %4 = vector.load %arg4[%c0_5, %c0_6, %c0_7] : memref<1x8x8xbf16, #tpu.memory_space<vmem>>, vector<1x8x8xbf16>
    %5 = vector.shape_cast %4 : vector<1x8x8xbf16> to vector<8x8xbf16>
    %6 = arith.extf %5 : vector<8x8xbf16> to vector<8x8xf32>
    %cst = arith.constant 1.767580e-01 : bf16
    %7 = vector.broadcast %cst : bf16 to vector<8x32xbf16>
    %8 = arith.mulf %1, %7 : vector<8x32xbf16>
    %cst_8 = arith.constant dense<0.000000e+00> : vector<8x8xf32>
    %9 = tpu.matmul %8, %3, %cst_8 {dimension_numbers = #tpu.dot_dimension_numbers<[1], [1], [0], [0], [0, 0, 1, 0], [], []>} : vector<8x32xbf16>, vector<8x32xbf16>, vector<8x8xf32> -> vector<8x8xf32>
    %10 = arith.mulf %9, %6 : vector<8x8xf32>
    %cst_9 = arith.constant 1.000000e+00 : f32
    %11 = vector.broadcast %cst_9 : f32 to vector<8x8xf32>
    %12 = arith.subf %6, %11 : vector<8x8xf32>
    %cst_10 = arith.constant 1.000000e+09 : f32
    %13 = vector.broadcast %cst_10 : f32 to vector<8x8xf32>
    %14 = arith.mulf %12, %13 : vector<8x8xf32>
    %15 = arith.addf %10, %14 : vector<8x8xf32>
    %cst_11 = arith.constant dense<0xFF800000> : vector<8xf32>
    %16 = vector.multi_reduction <maximumf>, %15, %cst_11 [1] : vector<8x8xf32> to vector<8xf32>
    %17 = vector.shape_cast %16 : vector<8xf32> to vector<8x1xf32>
    %18 = vector.broadcast %17 : vector<8x1xf32> to vector<8x8xf32>
    %19 = arith.subf %15, %18 : vector<8x8xf32>
    %20 = math.exp %19 : vector<8x8xf32>
    %cst_12 = arith.constant dense<0.000000e+00> : vector<8xf32>
    %21 = vector.multi_reduction <add>, %20, %cst_12 [1] : vector<8x8xf32> to vector<8xf32>
    %22 = vector.shape_cast %21 : vector<8xf32> to vector<8x1xf32>
    %23 = tpu.reciprocal %22 {approx = true} : vector<8x1xf32> -> vector<8x1xf32>
    %24 = arith.truncf %20 : vector<8x8xf32> to vector<8x8xbf16>
    %cst_13 = arith.constant dense<0.000000e+00> : vector<8x32xf32>
    %25 = tpu.matmul %24, %3, %cst_13 {dimension_numbers = #tpu.dot_dimension_numbers<[1], [0], [0], [1], [0, 0, 1, 1], [], []>} : vector<8x8xbf16>, vector<8x32xbf16>, vector<8x32xf32> -> vector<8x32xf32>
    %26 = vector.broadcast %23 : vector<8x1xf32> to vector<8x32xf32>
    %27 = arith.mulf %25, %26 : vector<8x32xf32>
    %c0_14 = arith.constant 0 : index
    %c0_15 = arith.constant 0 : index
    %28 = vector.load %arg5[%c0_14, %c0_15] : memref<32x32xbf16, #tpu.memory_space<vmem>>, vector<32x32xbf16>
    %cst_16 = arith.constant dense<0.000000e+00> : vector<8x32xf32>
    %29 = tpu.matmul %1, %28, %cst_16 {dimension_numbers = #tpu.dot_dimension_numbers<[1], [0], [0], [1], [0, 0, 1, 1], [], []>} : vector<8x32xbf16>, vector<32x32xbf16>, vector<8x32xf32> -> vector<8x32xf32>
    %30 = arith.truncf %27 : vector<8x32xf32> to vector<8x32xbf16>
    %c0_17 = arith.constant 0 : index
    %c0_18 = arith.constant 0 : index
    %31 = vector.load %arg6[%c0_17, %c0_18] : memref<32x32xbf16, #tpu.memory_space<vmem>>, vector<32x32xbf16>
    %cst_19 = arith.constant dense<0.000000e+00> : vector<8x32xf32>
    %32 = tpu.matmul %30, %31, %cst_19 {dimension_numbers = #tpu.dot_dimension_numbers<[1], [0], [0], [1], [0, 0, 1, 1], [], []>} : vector<8x32xbf16>, vector<32x32xbf16>, vector<8x32xf32> -> vector<8x32xf32>
    %33 = arith.addf %29, %32 : vector<8x32xf32>
    %c0_20 = arith.constant 0 : index
    %c0_21 = arith.constant 0 : index
    %34 = vector.load %arg7[%c0_20, %c0_21] : memref<1x32xf32, #tpu.memory_space<vmem>>, vector<1x32xf32>
    %35 = vector.broadcast %34 : vector<1x32xf32> to vector<8x32xf32>
    %36 = arith.addf %33, %35 : vector<8x32xf32>
    %cst_22 = arith.constant dense<0.000000e+00> : vector<8xf32>
    %37 = vector.multi_reduction <add>, %36, %cst_22 [1] : vector<8x32xf32> to vector<8xf32>
    %38 = vector.shape_cast %37 : vector<8xf32> to vector<8x1xf32>
    %cst_23 = arith.constant 3.200000e+01 : f32
    %39 = vector.broadcast %cst_23 : f32 to vector<8x1xf32>
    %40 = arith.divf %38, %39 : vector<8x1xf32>
    %41 = vector.broadcast %40 : vector<8x1xf32> to vector<8x32xf32>
    %42 = arith.subf %36, %41 : vector<8x32xf32>
    %43 = arith.mulf %42, %42 : vector<8x32xf32>
    %cst_24 = arith.constant dense<0.000000e+00> : vector<8xf32>
    %44 = vector.multi_reduction <add>, %43, %cst_24 [1] : vector<8x32xf32> to vector<8xf32>
    %45 = vector.shape_cast %44 : vector<8xf32> to vector<8x1xf32>
    %cst_25 = arith.constant 3.200000e+01 : f32
    %46 = vector.broadcast %cst_25 : f32 to vector<8x1xf32>
    %47 = arith.divf %45, %46 : vector<8x1xf32>
    %48 = vector.broadcast %40 : vector<8x1xf32> to vector<8x32xf32>
    %49 = arith.subf %36, %48 : vector<8x32xf32>
    %cst_26 = arith.constant 9.99999996E-13 : f32
    %50 = vector.broadcast %cst_26 : f32 to vector<8x1xf32>
    %51 = arith.addf %47, %50 : vector<8x1xf32>
    %52 = math.rsqrt %51 : vector<8x1xf32>
    %53 = vector.broadcast %52 : vector<8x1xf32> to vector<8x32xf32>
    %54 = arith.mulf %49, %53 : vector<8x32xf32>
    %c0_27 = arith.constant 0 : index
    %c0_28 = arith.constant 0 : index
    %55 = vector.load %arg8[%c0_27, %c0_28] : memref<1x32xf32, #tpu.memory_space<vmem>>, vector<1x32xf32>
    %56 = vector.broadcast %55 : vector<1x32xf32> to vector<8x32xf32>
    %57 = arith.mulf %54, %56 : vector<8x32xf32>
    %c0_29 = arith.constant 0 : index
    %c0_30 = arith.constant 0 : index
    %58 = vector.load %arg9[%c0_29, %c0_30] : memref<1x32xf32, #tpu.memory_space<vmem>>, vector<1x32xf32>
    %59 = vector.broadcast %58 : vector<1x32xf32> to vector<8x32xf32>
    %60 = arith.addf %57, %59 : vector<8x32xf32>
    %c0_31 = arith.constant 0 : index
    %c0_32 = arith.constant 0 : index
    %c0_33 = arith.constant 0 : index
    %61 = vector.load %arg10[%c0_31, %c0_32, %c0_33] : memref<1x8x32xf32, #tpu.memory_space<vmem>>, vector<1x8x32xf32>
    %62 = vector.shape_cast %61 : vector<1x8x32xf32> to vector<8x32xf32>
    %63 = vector.shape_cast %60 : vector<8x32xf32> to vector<1x8x32xf32>
    tpu.vector_store %arg10[%c0_31, %c0_32, %c0_33], %63 {strides = array<i32>} : memref<1x8x32xf32, #tpu.memory_space<vmem>>, vector<1x8x32xf32>,
    return
  }
  func.func @transform_0(%arg0: i32, %arg1: i32) -> (i32, i32, i32) {
    %c0_i32 = arith.constant 0 : i32
    %c0_i32_0 = arith.constant 0 : i32
    return %arg0, %arg1, %c0_i32 : i32, i32, i32
  }
  func.func @transform_1(%arg0: i32, %arg1: i32) -> (i32, i32, i32) {
    %c0_i32 = arith.constant 0 : i32
    %c0_i32_0 = arith.constant 0 : i32
    %c0_i32_1 = arith.constant 0 : i32
    return %arg0, %c0_i32, %c0_i32_0 : i32, i32, i32
  }
  func.func @transform_2(%arg0: i32, %arg1: i32) -> (i32, i32, i32) {
    %c0_i32 = arith.constant 0 : i32
    %c0_i32_0 = arith.constant 0 : i32
    return %arg0, %arg1, %c0_i32 : i32, i32, i32
  }
  func.func @transform_3(%arg0: i32, %arg1: i32) -> (i32, i32) {
    %c0_i32 = arith.constant 0 : i32
    %c0_i32_0 = arith.constant 0 : i32
    %c0_i32_1 = arith.constant 0 : i32
    return %c0_i32, %c0_i32_0 : i32, i32
  }
  func.func @transform_4(%arg0: i32, %arg1: i32) -> (i32, i32) {
    %c0_i32 = arith.constant 0 : i32
    %c0_i32_0 = arith.constant 0 : i32
    %c0_i32_1 = arith.constant 0 : i32
    return %c0_i32, %c0_i32_0 : i32, i32
  }
  func.func @transform_5(%arg0: i32, %arg1: i32) -> (i32, i32) {
    %c0_i32 = arith.constant 0 : i32
    %c0_i32_0 = arith.constant 0 : i32
    %c0_i32_1 = arith.constant 0 : i32
    return %c0_i32, %c0_i32_0 : i32, i32
  }
  func.func @transform_6(%arg0: i32, %arg1: i32) -> (i32, i32) {
    %c0_i32 = arith.constant 0 : i32
    %c0_i32_0 = arith.constant 0 : i32
    %c0_i32_1 = arith.constant 0 : i32
    return %c0_i32, %c0_i32_0 : i32, i32
  }
  func.func @transform_7(%arg0: i32, %arg1: i32) -> (i32, i32) {
    %c0_i32 = arith.constant 0 : i32
    %c0_i32_0 = arith.constant 0 : i32
    %c0_i32_1 = arith.constant 0 : i32
    return %c0_i32, %c0_i32_0 : i32, i32
  }
  func.func @transform_8(%arg0: i32, %arg1: i32) -> (i32, i32, i32) {
    %c0_i32 = arith.constant 0 : i32
    %c0_i32_0 = arith.constant 0 : i32
    return %arg0, %arg1, %c0_i32 : i32, i32, i32
  }
}

</mosaic_0001>

<bundles_post_ra>
// kernel: tpu_custom_call.1
= control target key start
LH: loop header
LB: loop body
LE: loop exit
PB: predicated region body
PF: predicated region fallthrough
CT: control target
= control target key end

     0   :  { %s1686_s0 = inlined_call_operand.hbm [shape: bf16[2,8,32], index: 0, kind: input, shape index: {}]   ;;  %s1687_s1 = inlined_call_operand.hbm [shape: bf16[2,8,32], index: 1, kind: input, shape index: {}]   ;;  %s1688_s2 = inlined_call_operand.hbm [shape: bf16[2,8,8], index: 2, kind: input, shape index: {}]   ;;  %s1689_s3 = inlined_call_operand.hbm [shape: bf16[32,32], index: 3, kind: input, shape index: {}]   ;;  %s1690_s4 = inlined_call_operand.hbm [shape: bf16[32,32], index: 4, kind: input, shape index: {}]   ;;  %s1691_s5 = inlined_call_operand.vmem [shape: f32[1,32], index: 5, kind: input, shape index: {}]   ;;  %s1692_s6 = inlined_call_operand.vmem [shape: f32[1,32], index: 6, kind: input, shape index: {}]   ;;  %s1693_s7 = inlined_call_operand.vmem [shape: f32[1,32], index: 7, kind: input, shape index: {}]   ;;  %s1694_s8 = inlined_call_operand.hbm [shape: f32[2,8,32], index: 8, kind: output, shape index: {}]  }
   0x1   :  { %1715 = sst [smem:[#allocation22_spill]] %s1687_s1 }
   0x2   :  { %1716 = sst [smem:[#allocation23_spill]] %s1689_s3 }
   0x3   :  { %1717 = sst [smem:[#allocation24_spill]] %s1690_s4 }
   0x4   :  { %13 = vsyncpa [#allocation3], 0 }
   0x5   :  { %15 = vsyncpa [#allocation3 + $0x1], 0 }
   0x6   :  { %16 = vsyncpa [#allocation6], 0 }
   0x7   :  { %18 = vsyncpa [#allocation6 + $0x1], 0 }
   0x8   :  { %19 = vsyncpa [#allocation9], 0 }
   0x9   :  { %20 = vsyncpa [#allocation4], 0 }
   0xa   :  { %22 = vsyncpa [#allocation4 + $0x1], 0  ;;  %s1347_s27 = smov 0   ;;  %s1349_s28 = smov 0  }
   0xb   :  { %s1351_s29 = smov 0   ;;  %s1353_s30 = smov 0  }
   0xc   :  { %s1355_s9 = smov 0   ;;  %s1357_s10 = smov 0  }
   0xd LB: > { %1718 = sst [smem:[#allocation16_spill]] %s1270_s27  ;;  %s1378_s11 = sadd.s32 4294967295, %s1290_s10   ;;  %s1290_s10 = sphi %s1357_s10, %s28_s10   ;;  %s1286_s9 = sphi %s1355_s9, %s1756_s9   ;;  %s1282_s30 = sphi %s1353_s30, %s1755_s30   ;;  %s1278_s29 = sphi %s1351_s29, %s1759_s29   ;;  %s1274_s28 = sphi %s1349_s28, %s1758_s28   ;;  %s1270_s27 = sphi %s1347_s27, %s1757_s27  }
   0xe   : > { %1719 = sst [smem:[#allocation17_spill]] %s1286_s9  ;;  %s875_s12 = sadd.s32 4294967294, %s1290_s10  }
   0xf   : > { %1720 = sst [smem:[#allocation18_spill]] %s1290_s10  ;;  %p62_p0 = scmp.ne.s32.totalorder %s1274_s28, %s1270_s27 }
  0x10   : > { %p1695_p1 = scmp.eq.s32.totalorder %s1378_s11, 0  ;;  %p253_p3 = scmp.eq.s32.totalorder %s875_s12, 1 }
  0x11   : > { %p876_p5 = scmp.ge.s32.totalorder %s1290_s10, 1  ;;  %p260_p7 = scmp.lt.s32.totalorder %s1290_s10, 3 }
  0x12   : > { %p1387_p4 = por %p1695_p1, %p62_p0  ;;  %p1392_p6 = por %p253_p3, %p62_p0 }
  0x13   : > { %p1397_p8 = pnand %p876_p5, %p260_p7  ;;  %s1292_s16 = smov [#allocation8]  }
  0x14   : > { %s1721_s13 = scalar_select %p1387_p4, 1, 0 }
  0x15   : > { %s1722_s14 = scalar_select %p1392_p6, 1, 0 }
  0x16   : > { %s1724_s15 = scalar_select %p1397_p8, 1, 0 }
  0x17   : > { %1723 = sst [smem:[#allocation19_spill]] %s1722_s14  ;;  %s272_s17 = sshll.u32 %s1292_s16, 4  ;;  %s273_s17 = int_to_ptr.vmem [resolvable:$true] %s272_s17 }
  0x18   : > { %p963_p9 = pneg %p1397_p8  ;;  %s40_s19 = sadd.s32 1, %s1286_s9 }
  0x19   : > { %s1726_s3 = sld [smem:[#allocation23_spill]] }
  0x1a   : > { %p1406_p11 = pnand %p963_p9, %p1695_p1 }
  0x1c   : > { %s1725_s18 = scalar_select %p1406_p11, 1, 0 }
  0x1d   : > { %p1707_p13 = pneg %p1406_p11 }
  0x1f   : > { %s1054_s22 = scalar_lea.hbm %s1726_s3, 256 }
  0x20   : > { %p1055_p12 = scmp.ne.s32.totalorder %s1726_s3, %s1054_s22  ;;  %p1061_p5 = scmp.lt.u32.totalorder %s1054_s22, %s1726_s3 }
  0x22   : > { %p1057_p0 = pnand %p1707_p13, %p1055_p12 }
  0x24   : > { %p1058_p3 = pneg %p1057_p0 }
  0x26   : > { %p1063_p7 = pnand %p1061_p5, %p1058_p3 }
  0x28   : > { %1066 = shalt.err (!%p1063_p7)
}
  0x29   : > { %s1067_s12 = scalar_lea.vmem %s273_s17, 256  ;;  %p1075_p2 = scmp.lt.s32.totalorder %s273_s17, %s273_s17 }
  0x2a   : > { %p1068_p9 = scmp.ne.s32.totalorder %s273_s17, %s1067_s12  ;;  %p1076_p6 = scmp.lt.s32.totalorder %s1067_s12, %s1067_s12 }
  0x2c   : > { %p1070_p10 = pnand %p1068_p9, %p1707_p13  ;;  %p1077_p4 = por %p1076_p6, %p1075_p2 }
  0x2e   : > { %p1071_p1 = pneg %p1070_p10 }
  0x30   : > { %p1078_p8 = pnand %p1077_p4, %p1071_p1 }
  0x32   : > { %1081 = shalt.err (!%p1078_p8)
}
  0x33   : > { %s1698_s16 = smov 64   ;;  %s1699_s20 = smov 4  }
  0x34   : > { %966 = dma.hbm_to_vmem [thread:$0]  (!%p1406_p11), %s1726_s3, 256, %s273_s17, [#allocation9], %s1698_s16, %s1698_s16, %s1699_s20  }
  0x35   : > { %p42_p1 = scmp.ge.s32.totalorder %s40_s19, 2  ;;  %s49_s23 = sadd.s32 1, %s1278_s29 }
  0x36   : > { %p56_p2 = scmp.ne.s32.totalorder %s1278_s29, %s1274_s28  ;;  %p57_p4 = scmp.eq.s32.totalorder %s1290_s10, 0 }
  0x37   : > { %s1761_s19 = smov (%p42_p1, %s40_s19), 0  ;;  %p1728_p8 = scmp.eq.s32.totalorder %s1378_s11, 1 }
  0x38   : > { %1727 = sst [smem:[#allocation20_spill]] %s1761_s19  ;;  %p58_p6 = por %p57_p4, %p56_p2 }
  0x39   : > { %p1444_p10 = por %p1728_p8, %p56_p2  ;;  %s44_s25 = ssub.s32 %s1286_s9, %s1761_s19 }
  0x3a   : > { %p986_p12 = scmp.lt.s32.totalorder %s1290_s10, 2  ;;  %p47_p0 = scmp.eq.s32.totalorder %s44_s25, 0 }
  0x3b   : > { %s1729_s24 = scalar_select %p1444_p10, 1, 0 }
  0x3c   : > { %s1700_s26 = sand.u32 1, %s1278_s29   ;;  %s1457_s12 = sshll.u32 %s1286_s9, 6 }
  0x3d   : > { %s1454_s17 = sshll.u32 %s1700_s26, 2  ;;  %p1462_p3 = pnand %p986_p12, %p58_p6 }
  0x3e   : > { %s1460_s21 = scalar_select %p47_p0, %s1278_s29, %s49_s23  }
  0x3f   : > { %s1731_s22 = scalar_select %p1462_p3, 1, 0 }
  0x40   : > { %1730 = sst [smem:[#allocation21_spill]] %s1460_s21  ;;  %s327_s16 = sand.u32 1, %s1290_s10  }
  0x41   : > { %s1732_s1 = sld [smem:[#allocation22_spill]]  ;;  %s331_s26 = scalar_lea.vmem [#allocation5], %s1454_s17 }
  0x42   : > { %s338_s19 = sshll.u32 %s331_s26, 4  ;;  %s1295_s23 = smov [#allocation10]   ;;  %s1474_s19 = int_to_ptr.vmem [resolvable:$true] %s338_s19 }
  0x43   : > { %s1476_s9 = sshll.u32 %s1295_s23, 4  ;;  %s1478_s21 = scalar_lea.sflag [#allocation6], %s327_s16  ;;  %s286_s9 = int_to_ptr.vmem [resolvable:$true] %s1476_s9 }
  0x44   : > { %p1484_p7 = pneg %p1462_p3 }
  0x46   : > { %s1733_s3 = scalar_select %p1484_p7, 1, 0 }
  0x47   : > { %s1471_s25 = scalar_lea.hbm %s1732_s1, %s1457_s12  ;;  %s1087_s10 = scalar_lea.hbm %s1732_s1, 128 }
  0x48   : > { %s1082_s14 = scalar_lea.hbm %s1471_s25, 64  ;;  %p1088_p2 = scmp.lt.u32.totalorder %s1471_s25, %s1732_s1 }
  0x49   : > { %p1083_p5 = scmp.ne.s32.totalorder %s1471_s25, %s1082_s14  ;;  %p1089_p4 = scmp.lt.u32.totalorder %s1087_s10, %s1082_s14 }
  0x4a   : > { %p1091_p8 = scmp.lt.u32.totalorder %s1082_s14, %s1471_s25 }
  0x4b   : > { %p1085_p9 = pnand %p1484_p7, %p1083_p5  ;;  %p1090_p6 = por %p1089_p4, %p1088_p2 }
  0x4d   : > { %p1086_p1 = pneg %p1085_p9  ;;  %p1092_p12 = por %p1091_p8, %p1090_p6 }
  0x4f   : > { %p1093_p0 = pnand %p1092_p12, %p1086_p1 }
  0x51   : > { %1096 = shalt.err (!%p1093_p0)
}
  0x52   : > { %s1097_s16 = scalar_lea.vmem %s1474_s19, 64  ;;  %s1296_s20 = smov [#allocation5]  }
  0x53   : > { %p1098_p5 = scmp.ne.s32.totalorder %s1474_s19, %s1097_s16  ;;  %s1102_s26 = sshll.u32 %s1296_s20, 4  ;;  %s1103_s26 = int_to_ptr.vmem [resolvable:$false] %s1102_s26 }
  0x54   : > { %s1104_s27 = scalar_lea.vmem %s1103_s26, 128  ;;  %p1105_p10 = scmp.lt.s32.totalorder %s1474_s19, %s1103_s26 }
  0x55   : > { %p1100_p9 = pnand %p1098_p5, %p1484_p7  ;;  %p1106_p11 = scmp.lt.s32.totalorder %s1104_s27, %s1097_s16 }
  0x57   : > { %p1101_p13 = pneg %p1100_p9  ;;  %p1107_p2 = por %p1106_p11, %p1105_p10 }
  0x59   : > { %p1108_p4 = pnand %p1107_p2, %p1101_p13 }
  0x5b   : > { %1111 = shalt.err (!%p1108_p4)
}
  0x5c   : > { %976 = dma.hbm_to_vmem [thread:$0]  (!%p1462_p3), %s1471_s25, 64, %s1474_s19, %s1478_s21  }
  0x5d   : > { %s1734_s4 = sld [smem:[#allocation24_spill]]  ;;  %p1735_p11 = scmp.ne.s32.totalorder %s1725_s18, 0 }
  0x5f   : > { %p1736_p13 = pneg %p1735_p11 }
  0x63   : > { %s1112_s23 = scalar_lea.hbm %s1734_s4, 256 }
  0x64   : > { %p1113_p1 = scmp.ne.s32.totalorder %s1734_s4, %s1112_s23  ;;  %p1119_p8 = scmp.lt.u32.totalorder %s1112_s23, %s1734_s4 }
  0x66   : > { %p1115_p10 = pnand %p1113_p1, %p1736_p13 }
  0x68   : > { %p1116_p6 = pneg %p1115_p10 }
  0x6a   : > { %p1121_p12 = pnand %p1119_p8, %p1116_p6 }
  0x6c   : > { %1124 = shalt.err (!%p1121_p12)
}
  0x6d   : > { %s1125_s19 = scalar_lea.vmem %s286_s9, 256  ;;  %p1737_p5 = pmov %p1736_p13 }
  0x6e   : > { %p1126_p0 = scmp.ne.s32.totalorder %s286_s9, %s1125_s19  ;;  %p1133_p4 = scmp.lt.s32.totalorder %s286_s9, %s286_s9 }
  0x6f   : > { %p1134_p3 = scmp.lt.s32.totalorder %s1125_s19, %s1125_s19 }
  0x70   : > { %p1128_p9 = pnand %p1126_p0, %p1737_p5 }
  0x71   : > { %p1135_p7 = por %p1134_p3, %p1133_p4 }
  0x72   : > { %p1129_p2 = pneg %p1128_p9 }
  0x74   : > { %p1136_p1 = pnand %p1135_p7, %p1129_p2 }
  0x76   : > { %1139 = shalt.err (!%p1136_p1)
}
  0x77   : > { %s1738_s1 = smov 4   ;;  %s1739_s25 = smov 64  }
  0x78   : > { %969 = dma.hbm_to_vmem [thread:$0]  (!%p1735_p11), %s1734_s4, 256, %s286_s9, [#allocation9], %s1739_s25, %s1739_s25, %s1738_s1  }
  0x79   : > { %s1536_s20 = scalar_lea.hbm %s1686_s0, %s1457_s12  ;;  %s312_s18 = scalar_lea.vmem [#allocation2], %s1454_s17 }
  0x7a   : > { %s320_s16 = sshll.u32 %s312_s18, 4  ;;  %s1545_s27 = scalar_lea.hbm %s1688_s2, %s1457_s12  ;;  %s1539_s16 = int_to_ptr.vmem [resolvable:$true] %s320_s16 }
  0x7b   : > { %s1740_s10 = sand.u32 1, %s1278_s29   ;;  %s1140_s1 = scalar_lea.hbm %s1536_s20, 64 }
  0x7c   : > { %s309_s9 = scalar_lea.sflag [#allocation3], %s1740_s10  ;;  %p1141_p3 = scmp.ne.s32.totalorder %s1536_s20, %s1140_s1 }
  0x7d   : > { %p1741_p7 = scmp.ne.s32.totalorder %s1733_s3, 0  ;;  %s1145_s23 = scalar_lea.hbm %s1686_s0, 128 }
  0x7e   : > { %p1146_p10 = scmp.lt.u32.totalorder %s1536_s20, %s1686_s0  ;;  %p1147_p6 = scmp.lt.u32.totalorder %s1145_s23, %s1140_s1 }
  0x7f   : > { %p1143_p11 = pnand %p1141_p3, %p1741_p7  ;;  %p1149_p12 = scmp.lt.u32.totalorder %s1140_s1, %s1536_s20 }
  0x80   : > { %p1148_p8 = por %p1147_p6, %p1146_p10 }
  0x81   : > { %p1144_p13 = pneg %p1143_p11 }
  0x82   : > { %p1150_p0 = por %p1149_p12, %p1148_p8 }
  0x84   : > { %p1151_p5 = pnand %p1150_p0, %p1144_p13 }
  0x86   : > { %1154 = shalt.err (!%p1151_p5)
}
  0x87   : > { %s1155_s12 = scalar_lea.vmem %s1539_s16, 64  ;;  %s1297_s26 = smov [#allocation2]  }
  0x88   : > { %p1156_p9 = scmp.ne.s32.totalorder %s1539_s16, %s1155_s12  ;;  %s1160_s19 = sshll.u32 %s1297_s26, 4  ;;  %s1161_s19 = int_to_ptr.vmem [resolvable:$false] %s1160_s19 }
  0x89   : > { %s1162_s4 = scalar_lea.vmem %s1161_s19, 128  ;;  %p1163_p1 = scmp.lt.s32.totalorder %s1539_s16, %s1161_s19 }
  0x8a   : > { %p1158_p2 = pnand %p1156_p9, %p1741_p7  ;;  %p1164_p3 = scmp.lt.s32.totalorder %s1162_s4, %s1155_s12 }
  0x8c   : > { %p1159_p4 = pneg %p1158_p2  ;;  %p1165_p11 = por %p1164_p3, %p1163_p1 }
  0x8e   : > { %p1166_p10 = pnand %p1165_p11, %p1159_p4 }
  0x90   : > { %1169 = shalt.err (!%p1166_p10)
}
  0x91   : > { %p1742_p13 = scmp.ne.s32.totalorder %s1731_s22, 0  ;;  %s349_s10 = scalar_lea.vmem [#allocation7], %s1454_s17 }
  0x92   : > { %s357_s1 = sshll.u32 %s349_s10, 4  ;;  %s1170_s25 = scalar_lea.hbm %s1545_s27, 64  ;;  %s358_s1 = int_to_ptr.vmem [resolvable:$true] %s357_s1 }
  0x93   : > { %973 = dma.hbm_to_vmem [thread:$0]  (!%p1742_p13), %s1536_s20, 64, %s1539_s16, %s309_s9  }
  0x94   : > { %p1171_p6 = scmp.ne.s32.totalorder %s1545_s27, %s1170_s25  ;;  %s1175_s18 = scalar_lea.hbm %s1688_s2, 128 }
  0x95   : > { %p1176_p0 = scmp.lt.u32.totalorder %s1545_s27, %s1688_s2  ;;  %p1177_p5 = scmp.lt.u32.totalorder %s1175_s18, %s1170_s25 }
  0x96   : > { %p1173_p8 = pnand %p1171_p6, %p1741_p7  ;;  %p1179_p2 = scmp.lt.u32.totalorder %s1170_s25, %s1545_s27 }
  0x97   : > { %p1178_p9 = por %p1177_p5, %p1176_p0 }
  0x98   : > { %p1174_p12 = pneg %p1173_p8 }
  0x99   : > { %p1180_p4 = por %p1179_p2, %p1178_p9 }
  0x9b   : > { %p1181_p1 = pnand %p1180_p4, %p1174_p12 }
  0x9d   : > { %1184 = shalt.err (!%p1181_p1)
}
  0x9e   : > { %s1185_s17 = scalar_lea.vmem %s358_s1, 64  ;;  %s1298_s20 = smov [#allocation7]  }
  0x9f   : > { %p1186_p3 = scmp.ne.s32.totalorder %s358_s1, %s1185_s17  ;;  %s1190_s16 = sshll.u32 %s1298_s20, 4  ;;  %s1191_s16 = int_to_ptr.vmem [resolvable:$false] %s1190_s16 }
  0xa0   : > { %s1192_s9 = scalar_lea.vmem %s1191_s16, 128  ;;  %p1193_p6 = scmp.lt.s32.totalorder %s358_s1, %s1191_s16 }
  0xa1   : > { %p1188_p11 = pnand %p1186_p3, %p1741_p7  ;;  %p1194_p8 = scmp.lt.s32.totalorder %s1192_s9, %s1185_s17 }
  0xa3   : > { %p1189_p10 = pneg %p1188_p11  ;;  %p1195_p13 = por %p1194_p8, %p1193_p6 }
  0xa5   : > { %p1196_p0 = pnand %p1195_p13, %p1189_p10 }
  0xa7   : > { %1199 = shalt.err (!%p1196_p0)
}
  0xa8   : > { %p1743_p5 = scmp.ne.s32.totalorder %s1731_s22, 0  ;;  %p1744_p12 = scmp.ne.s32.totalorder %s1724_s15, 0 }
  0xa9   : > { %s1592_s3 = sand.u32 (!%p1744_p12), 1, %s1274_s28   ;;  %p1745_p7 = scmp.ne.s32.totalorder (!%p1744_p12), %s1721_s13, 0 }
  0xaa   : > { %979 = dma.hbm_to_vmem [thread:$0]  (!%p1743_p5), %s1545_s27, 64, %s358_s1, %s1478_s21  }
  0xab   : > { %366 = sbr.rel (%p1744_p12) target bundleno = 1330 (0x532), region = 52  ;;  %s887_s19 = sshll.u32 (!%p1744_p12), %s1592_s3, 2 }
  0xac   : > { %s369_s4 = scalar_lea.sflag (!%p1744_p12), [#allocation3], %s1592_s3  ;;  %s372_s10 = scalar_lea.vmem (!%p1744_p12), [#allocation2], %s887_s19 }
  0xb2   : > { %1253 = dma.done.wait (%p1745_p7), %s369_s4, 64  }
  0xb3   : > { %1255 = vsyncadd (%p1745_p7), %s369_s4, 4294967232  ;;  %s377_s21 = sand.u32 1, %s1378_s11   ;;  %s381_s15 = scalar_lea.vmem [#allocation5], %s887_s19 }
  0xb4   : > { %s378_s22 = scalar_lea.sflag [#allocation6], %s377_s21 }
  0xb5   : > { %1257 = dma.done.wait (%p1745_p7), %s378_s22, 128  }
  0xb6   : > { %1259 = vsyncadd (%p1745_p7), %s378_s22, 4294967168  ;;  %s390_s27 = scalar_lea.vmem [#allocation7], %s887_s19  ;;  %p1746_p13 = scmp.eq.s32.totalorder %s1378_s11, 0 }
  0xb8   : > { %1261 = dma.done.wait (%p1746_p13), [#allocation9], 512   ;;  %p1747_p9 = pmov %p1746_p13 }
  0xb9   : > { %v1299_v0 = vmov 0.0   ;;  %vm1300_vm0 = vmmov 0   ;;  %vm448_vm1 = vcmask 261120   ;;  %v444_v1 = vld [vmem:[%s381_s15] sm:$0xf]  ;;  %vm499_vm2 = vcmask 64512  }
  0xba   : > { %1263 = vsyncadd (%p1747_p9), [#allocation9], 4294966784  ;;  %919 = vmatprep.subr.bf16.mxu0 %v1299_v0  ;;  %921 = vmatprep.mubr.msk.bf16.mxu0 %vm1300_vm0, %v1299_v0  ;;  %v453_v2 = vsel %vm448_vm1, %v444_v1, 0  ;;  %v443_v3 = vld [vmem:[%s372_s10] sm:$0xf]  ;;  %vm514_vm3 = vcmask 1043456  }
  0xbb   : > { %925 = vmatprep.subr.bf16.mxu1 %v1299_v0  ;;  %927 = vmatprep.mubr.msk.bf16.mxu1 %vm1300_vm0, %v1299_v0  ;;  %v447_v4 = vmul.bf16 1043676725, %v443_v3  ;;  %v445_v5 = vld [vmem:[%s390_s27] sm:$0xf]  ;;  %v515_v16 = vsel %vm514_vm3, %v444_v1, 0  ;;  %v1044_v23 = vld [vmem:[#allocation8] sm:$0xff]  }
  0xbc   : > { %920 = vmatpush3.bf16.xpose.msra.mxu0 %v453_v2  ;;  %v446_v6 = vunpack.c.l.bf16 %v445_v5  ;;  %926 = vmatpush3.bf16.msra.mxu1 %v515_v16  ;;  %v1045_v24 = vld [vmem:[#allocation10] sm:$0xff]   ;;  %v1046_v25 = vld [vmem:[#allocation8 + $0x8] sm:$0xff]   ;;  %v1047_v26 = vld [vmem:[#allocation10 + $0x8] sm:$0xff]   ;;  %s892_s1 = sshll.u32 %s1592_s3, 3  ;;  %s906_s12 = sshll.u32 %s1282_s30, 7 }
  0xbd   : > { %939 = vmatprep.subr.bf16.mxu0 %v1299_v0  ;;  %931 = vmatprep.subr.bf16.mxu1 %v1299_v0  ;;  %v902_v40 = vld [vmem:[%s1691_s5] ss:$0 sm:$0xff]  ;;  %s440_s26 = scalar_lea.vmem [#allocation11], %s892_s1  ;;  %s1636_s9 = scalar_lea.hbm %s1694_s8, %s906_s12 }
  0xbe   : > { %v894_v7 = vadd.f32 -1.0, %v446_v6  ;;  %v903_v56 = vld [vmem:[%s1692_s6] ss:$0 sm:$0xff]  ;;  %s731_s17 = sshll.u32 %s440_s26, 4  ;;  %s717_s19 = scalar_lea.sflag [#allocation4], %s1592_s3  ;;  %s1638_s17 = int_to_ptr.vmem [resolvable:$true] %s731_s17 }
  0xbf   : > { %v904_v58 = vld [vmem:[%s1693_s7] ss:$0 sm:$0xff]  ;;  %s1200_s4 = scalar_lea.vmem %s1638_s17, 128  ;;  %p1748_p4 = scmp.ne.s32.totalorder %s1729_s24, 0 }
  0xc0   : > { %v497_v8 = vmul.f32 1e+09, %v894_v7  ;;  %p1201_p2 = scmp.ne.s32.totalorder %s1638_s17, %s1200_s4  ;;  %s1301_s30 = smov [#allocation11]  }
  0xc1   : > { %s1204_s10 = sshll.u32 %s1301_s30, 4  ;;  %s1205_s10 = int_to_ptr.vmem [resolvable:$false] %s1204_s10 }
  0xc2   : > { %p1202_p1 = pnand %p1201_p2, %p1748_p4  ;;  %s1206_s21 = scalar_lea.vmem %s1205_s10, 256 }
  0xc3   : > { %922 = vmatmul.mubr.msk.bf16.vlgmr.msra.gmra.mrb[0].mxu0 %vm448_vm1, %v447_v4  ;;  %p1207_p11 = scmp.lt.s32.totalorder %s1638_s17, %s1205_s10  ;;  %p1208_p10 = scmp.lt.s32.totalorder %s1206_s21, %s1200_s4 }
  0xc4   : > { %943 = vmatprep.mubr.msk.bf16.mxu0 %vm1300_vm0, %v1299_v0  ;;  %940 = vmatpush3.bf16.msra.mxu0 %v1044_v23  ;;  %p1203_p3 = pneg %p1202_p1 }
  0xc5   : > { %941 = vmatprep.subr.bf16.mxu0 %v1299_v0  ;;  %p1209_p6 = por %p1208_p10, %p1207_p11 }
  0xc7   : > { %p1210_p8 = pnand %p1209_p6, %p1203_p3 }
  0xc8   : > { %942 = vmatpush3.bf16.msra.mxu0 %v1046_v25 }
  0xcb   : > { %944 = vmatmul.mubr.msk.bf16.vlgmr.msra.gmra.mrb[4].mxu0 %vm448_vm1, %v443_v3 }
 0x196   : > { %v489_v9 = vpop.f32.mrb[0].mxu0 }
 0x197   : > { %v495_v10 = vmul.f32 %v489_v9, %v446_v6  ;;  %v923_v11 = vpop.f32.mrb[1].mxu0 }
 0x198   : > { %v492_v12 = vpop.f32.mrb[2].mxu0 }
 0x199   : > { %v924_v13 = vpop.f32.mrb[3].mxu0  ;;  %v498_v14 = vadd.f32 %v497_v8, %v495_v10 }
 0x19b   : > { %v500_v15 = vsel %vm499_vm2, %v498_v14, -inf }
 0x19c   : > { %501 = vmax.xlane.f32.xlu0 %v500_v15 }
 0x19e   : > { %v671_v35 = vpop.f32.mrb[4].mxu0 }
 0x19f   : > { %v945_v36 = vpop.f32.mrb[5].mxu0 }
 0x1a0   : > { %v674_v37 = vpop.f32.mrb[6].mxu0 }
 0x1a1   : > { %v946_v38 = vpop.f32.mrb[7].mxu0 }
 0x229   : > { %v502_v17 = vpop.xlane.xlu0 %501 }
 0x22a   : > { %v503_v18 = vsub.f32 %v498_v14, %v502_v17 }
 0x22c   : > { %v504_v19 = vmul.f32 1.442695, %v503_v18 }
 0x22e   : > { %1048 = vpow2.f32 %v504_v19 }
 0x238   : > { %v1049_v20 = vpop.eup %1048 }
 0x239   : > { %v506_v21 = vsel %vm499_vm2, %v1049_v20, 0.0  ;;  %v510_v22 = vpack.c.bf16 %v1049_v20, %v1049_v20 }
 0x23a   : > { %507 = vadd.xlane.f32.xlu0 %v506_v21 }
 0x23b   : > { %928 = vmatmul.mubr.msk.bf16.vlgmr.msra.gmra.mrb[0].mxu1 %vm499_vm2, %v510_v22 }
 0x23c   : > { %935 = vmatprep.mubr.msk.bf16.mxu1 %vm1300_vm0, %v1299_v0  ;;  %932 = vmatpush3.bf16.msra.mxu1 %v1045_v24 }
 0x23d   : > { %933 = vmatprep.subr.bf16.mxu1 %v1299_v0 }
 0x240   : > { %934 = vmatpush3.bf16.msra.mxu1 %v1047_v26 }
 0x2c7   : > { %v508_v27 = vpop.xlane.xlu0 %507 }
 0x2c8   : > { %1050 = vrcp.f32 %v508_v27 }
 0x2d2   : > { %v1051_v28 = vpop.eup %1050 }
 0x30e   : > { %v551_v29 = vpop.f32.mrb[0].mxu1 }
 0x30f   : > { %v557_v30 = vmul.f32 %v1051_v28, %v551_v29  ;;  %v929_v31 = vpop.f32.mrb[1].mxu1 }
 0x310   : > { %v554_v32 = vpop.f32.mrb[2].mxu1 }
 0x311   : > { %v562_v33 = vpack.c.bf16 %v557_v30, %v557_v30  ;;  %v930_v34 = vpop.f32.mrb[3].mxu1 }
 0x313   : > { %936 = vmatmul.mubr.msk.bf16.vlgmr.msra.gmra.mrb[4].mxu1 %vm448_vm1, %v562_v33 }
 0x3e6   : > { %v616_v39 = vpop.f32.mrb[4].mxu1 }
 0x3e7   : > { %v672_v41 = vadd.f32 %v671_v35, %v616_v39  ;;  %v937_v42 = vpop.f32.mrb[5].mxu1 }
 0x3e8   : > { %v619_v43 = vpop.f32.mrb[6].mxu1 }
 0x3e9   : > { %v938_v44 = vpop.f32.mrb[7].mxu1  ;;  %v684_v45 = vadd.f32 %v902_v40, %v672_v41 }
 0x3eb   : > { %v685_v46 = vsel %vm448_vm1, %v684_v45, 0.0 }
 0x3ec   : > { %686 = vadd.xlane.f32.xlu1 %v685_v46 }
 0x479   : > { %v687_v47 = vpop.xlane.xlu1 %686 }
 0x47a   : > { %v689_v48 = vmul.f32 0.03125, %v687_v47 }
 0x47c   : > { %v690_v49 = vsub.f32 %v684_v45, %v689_v48 }
 0x47e   : > { %v691_v50 = vmul.f32 %v690_v49, %v690_v49 }
 0x480   : > { %v692_v51 = vsel %vm448_vm1, %v691_v50, 0.0 }
 0x481   : > { %693 = vadd.xlane.f32.xlu1 %v692_v51 }
 0x50e   : > { %v694_v52 = vpop.xlane.xlu1 %693 }
 0x50f   : > { %v695_v53 = vmul.f32 0.03125, %v694_v52 }
 0x511   : > { %v696_v54 = vadd.f32 1e-12, %v695_v53 }
 0x513   : > { %1052 = vrsqrt.f32 %v696_v54 }
 0x51d   : > { %v1053_v55 = vpop.eup %1052 }
 0x51e   : > { %v698_v57 = vmul.f32 %v1053_v55, %v690_v49 }
 0x520   : > { %v706_v59 = vmul.f32 %v903_v56, %v698_v57 }
 0x522   : > { %v714_v60 = vadd.f32 %v904_v58, %v706_v59 }
 0x524   : > { %715 = vst.msk [vmem:[%s440_s26] sm:$0xff] %vm448_vm1, %v714_v60 }
 0x525   : > { %1213 = shalt.err (!%p1210_p8)
}
 0x526   : > { %s1214_s3 = scalar_lea.hbm %s1636_s9, 128  ;;  %s1218_s27 = scalar_lea.hbm %s1694_s8, 256 }
 0x527   : > { %p1215_p0 = scmp.ne.s32.totalorder %s1636_s9, %s1214_s3  ;;  %p1219_p7 = scmp.lt.u32.totalorder %s1636_s9, %s1694_s8 }
 0x528   : > { %p1220_p13 = scmp.lt.u32.totalorder %s1218_s27, %s1214_s3  ;;  %p1222_p2 = scmp.lt.u32.totalorder %s1214_s3, %s1636_s9 }
 0x529   : > { %p1216_p5 = pnand %p1215_p0, %p1748_p4 }
 0x52a   : > { %p1221_p9 = por %p1220_p13, %p1219_p7 }
 0x52b   : > { %p1217_p12 = pneg %p1216_p5 }
 0x52c   : > { %p1223_p1 = por %p1222_p2, %p1221_p9 }
 0x52e   : > { %p1224_p3 = pnand %p1223_p1, %p1217_p12 }
 0x530   : > { %1227 = shalt.err (!%p1224_p3)
}
 0x531   : > { %961 = dma.vmem_to_hbm [thread:$0]  (%p1748_p4), %s1638_s17, 128, %s1636_s9, %s717_s19  }
 0x532 PF: > { %s1749_s1 = sld [smem:[#allocation16_spill]]  ;;  %s1750_s25 = sld [smem:[#allocation19_spill]] }
 0x533   : > { %s1751_s14 = sld [smem:[#allocation18_spill]] }
 0x538   : > { %s743_s23 = sand.u32 1, %s1749_s1   ;;  %p1752_p11 = scmp.ne.s32.totalorder %s1750_s25, 0 }
 0x539   : > { %p1753_p10 = scmp.ge.s32.totalorder %s1751_s14, 2  ;;  %s744_s18 = scalar_lea.sflag [#allocation4], %s743_s23 }
 0x53b   : > { %p981_p6 = pnand %p1753_p10, %p1752_p11 }
 0x53d   : > { %1265 = dma.done.wait (!%p981_p6), %s744_s18, 128  }
 0x53e   : > { %1267 = vsyncadd (!%p981_p6), %s744_s18, 4294967168  ;;  %s28_s10 = sadd.s32 1, %s1751_s14   ;;  %s1754_s24 = sld [smem:[#allocation21_spill]] }
 0x53f   : > { %p25_p8 = scmp.ge.s32.totalorder %s28_s10, 4   ;;  %s1755_s30 = sld [smem:[#allocation17_spill]] }
 0x540   : > { %s1756_s9 = sld [smem:[#allocation20_spill]]  ;;  %s1757_s27 = smov %s1274_s28 }
 0x541   : > { %s1758_s28 = smov %s1278_s29  ;;  %27 = sbr.rel (!%p25_p8) target bundleno = 13 (0xd), region = 129 }
 0x544   : > { %s1759_s29 = smov %s1754_s24 }
 0x548   :  { %749 = vsyncpa [#allocation3], 1 }
 0x549   :  { %751 = vsyncpa [#allocation3 + $0x1], 1 }
 0x54a   :  { %752 = vsyncpa [#allocation6], 1 }
 0x54b   :  { %754 = vsyncpa [#allocation6 + $0x1], 1 }
 0x54c   :  { %755 = vsyncpa [#allocation9], 1 }
 0x54d   :  { %756 = vsyncpa [#allocation4], 1 }
 0x54e   :  { %758 = vsyncpa [#allocation4 + $0x1], 1 }

</bundles_post_ra>
